<compile_context>
chip_gen: v7x
topology: tpu7x:2x2x1
jax: 0.10.0
libtpu: 0.0.40
codegen_flags: <defaults>
</compile_context>

<pallas_src>
import math
import numpy as np
import jax
import jax.numpy as jnp
from jax.experimental import pallas as pl
from jax.experimental.pallas import tpu as pltpu

# ---- module config (mirrors FourierEmbedder.__init__ defaults) --------------
NUM_FREQS = 6
INPUT_DIM = 3
INCLUDE_INPUT = True
INCLUDE_PI = True
LOGSPACE = True

EMB_DIM = INPUT_DIM * NUM_FREQS                                   # 18
OUT_DIM = INPUT_DIM * (NUM_FREQS * 2 + (1 if (INCLUDE_INPUT or NUM_FREQS == 0) else 0))  # 39
BASE = INPUT_DIM if (INCLUDE_INPUT and NUM_FREQS > 0) else 0      # row offset of sin block


def _frequencies() -> np.ndarray:
    if LOGSPACE:
        f = 2.0 ** np.arange(NUM_FREQS, dtype=np.float32)
    else:
        f = np.linspace(1.0, 2.0 ** (NUM_FREQS - 1), NUM_FREQS, dtype=np.float32)
    if INCLUDE_PI:
        f = f * np.float32(math.pi)
    return f.astype(np.float32)


FREQS = _frequencies()  # (NUM_FREQS,) registered-buffer equivalent


def _round_up(a: int, b: int) -> int:
    return -(-a // b) * b


# ---- Pallas kernel (channel-major / lane-dense) ------------------------------
def fourier_kernel(freqs_ref, x_ref, o_ref):
    # freqs_ref: (NUM_FREQS, 1) f32 column of frequencies
    # x_ref:     (INPUT_DIM, TN) f32 tile   (channels on sublanes, points on lanes)
    # o_ref:     (OUT_DIM,  TN) f32 tile
    x = x_ref[...]                       # (3, TN)
    freqs = freqs_ref[...]               # (6, 1)

    if INCLUDE_INPUT or NUM_FREQS == 0:
        o_ref[0:INPUT_DIM, :] = x        # rows 0..2 = x

    # For each input channel d: emb_d[k, :] = x[d, :] * freqs[k]  (d-major,
    # matching torch's (x[..., None] * freqs).view(...)).  All ops are full-lane.
    for d in range(INPUT_DIM):
        emb_d = x[d:d + 1, :] * freqs    # (1, TN) * (6, 1) -> (6, TN)
        s0 = BASE + d * NUM_FREQS
        c0 = BASE + EMB_DIM + d * NUM_FREQS
        o_ref[s0:s0 + NUM_FREQS, :] = jnp.sin(emb_d)
        o_ref[c0:c0 + NUM_FREQS, :] = jnp.cos(emb_d)


# ---- wrapper ----------------------------------------------------------------
def fourier_embed(x: jax.Array, *, tn: int = 16384) -> jax.Array:
    """x: (..., INPUT_DIM) float32 -> (..., OUT_DIM) float32."""
    if NUM_FREQS == 0:
        return x  # matches torch forward's early return

    orig_shape = x.shape
    assert orig_shape[-1] == INPUT_DIM
    n = int(np.prod(orig_shape[:-1])) if len(orig_shape) > 1 else 1
    x2 = x.reshape(n, INPUT_DIM).astype(jnp.float32)

    # Channel-major slab for the kernel: (INPUT_DIM, N), N padded to lane (128)
    # alignment (zero pad; padded lanes are never written back).
    xt = x2.T                                               # (3, n)
    n_pad = _round_up(n, 128)
    if n_pad != n:
        xt = jnp.pad(xt, ((0, 0), (0, n_pad - n)))

    # Lane tile: multiple of 128, big enough to amortize per-step overhead,
    # capped so the "parallel" grid keeps >= ~4 steps for v7x's 2 TensorCores.
    tn = max(128, (tn // 128) * 128)
    tn_cap = max(128, _round_up(-(-n_pad // 4), 128))
    tn_eff = min(tn, tn_cap, n_pad)
    grid = (pl.cdiv(n_pad, tn_eff),)

    freqs_col = jnp.asarray(FREQS, dtype=jnp.float32).reshape(NUM_FREQS, 1)

    cost = pl.CostEstimate(
        flops=INPUT_DIM * NUM_FREQS * n,                 # 18 muls / point (emb)
        transcendentals=2 * INPUT_DIM * NUM_FREQS * n,   # 36 sin/cos / point
        bytes_accessed=4 * (INPUT_DIM + OUT_DIM) * n,    # 168 B / point
    )

    out = pl.pallas_call(
        fourier_kernel,
        out_shape=jax.ShapeDtypeStruct((OUT_DIM, n_pad), jnp.float32),
        grid_spec=pltpu.PrefetchScalarGridSpec(
            num_scalar_prefetch=0,
            grid=grid,
            in_specs=[
                pl.BlockSpec((NUM_FREQS, 1), lambda i: (0, 0)),        # freqs column
                pl.BlockSpec((INPUT_DIM, tn_eff), lambda i: (0, i)),   # x, channel-major
            ],
            out_specs=pl.BlockSpec((OUT_DIM, tn_eff), lambda i: (0, i)),
        ),
        compiler_params=pltpu.CompilerParams(
            dimension_semantics=("parallel",)),
        cost_estimate=cost,
    )(freqs_col, xt)

    # Back to the module's row-major output layout (cheap vs. the compute).
    out = out[:, :n].T.reshape(*orig_shape[:-1], OUT_DIM)
    return out


# ---- reference (pure JAX) for verification ----------------------------------
def fourier_embed_ref(x: jax.Array) -> jax.Array:
    freqs = jnp.asarray(FREQS)
    emb = (x[..., None] * freqs).reshape(*x.shape[:-1], -1)
    if INCLUDE_INPUT:
        return jnp.concatenate([x, jnp.sin(emb), jnp.cos(emb)], axis=-1)
    return jnp.concatenate([jnp.sin(emb), jnp.cos(emb)], axis=-1)


if __name__ == "__main__":
    key = jax.random.PRNGKey(0)

    # Test 1: small point cloud of xyz coordinates (single grid step).
    x1 = jax.random.normal(key, (2, 8, INPUT_DIM), dtype=jnp.float32)
    out1 = jax.block_until_ready(fourier_embed(x1))
    ref1 = fourier_embed_ref(x1)
    assert out1.shape == (2, 8, OUT_DIM), out1.shape
    np.testing.assert_allclose(np.asarray(out1), np.asarray(ref1), rtol=1e-5, atol=2e-5)

    # Test 2: exercises a multi-step grid with a ragged final lane tile
    # (n = 200 points, lane tile = 128 -> grid of 2, last block partially valid).
    x2 = jax.random.normal(jax.random.PRNGKey(1), (4, 50, INPUT_DIM), dtype=jnp.float32)
    out2 = jax.block_until_ready(fourier_embed(x2, tn=128))
    ref2 = fourier_embed_ref(x2)
    assert out2.shape == (4, 50, OUT_DIM), out2.shape
    np.testing.assert_allclose(np.asarray(out2), np.asarray(ref2), rtol=1e-5, atol=2e-5)

    print("KERNEL_OK")
</pallas_src>

<mosaic_0001>
module attributes {stable_mosaic.version = 11 : i64} {
  func.func @fourier_kernel(%arg0: i32, %arg1: memref<6x1xf32, #tpu.memory_space<vmem>>, %arg2: memref<3x128xf32, #tpu.memory_space<vmem>>, %arg3: memref<39x128xf32, #tpu.memory_space<vmem>>) attributes {dimension_semantics = [#tpu.dimension_semantics<parallel>], iteration_bounds = array<i64: 1>, scalar_prefetch = 0 : i64, scratch_operands = 0 : i64, tpu.core_type = #tpu.core_type<tc>, window_params = [{pipeline_mode = #tpu.pipeline_mode<synchronous>, transform_indices = @transform_0, window_bounds = array<i64: 6, 1>}, {transform_indices = @transform_1, window_bounds = array<i64: 3, 128>}, {transform_indices = @transform_2, window_bounds = array<i64: 39, 128>}]} {
    %c0 = arith.constant 0 : index
    %c0_0 = arith.constant 0 : index
    %0 = vector.load %arg2[%c0, %c0_0] : memref<3x128xf32, #tpu.memory_space<vmem>>, vector<3x128xf32>
    %c0_1 = arith.constant 0 : index
    %c0_2 = arith.constant 0 : index
    %1 = vector.load %arg1[%c0_1, %c0_2] : memref<6x1xf32, #tpu.memory_space<vmem>>, vector<6x1xf32>
    %c0_3 = arith.constant 0 : index
    %c0_4 = arith.constant 0 : index
    %2 = vector.load %arg3[%c0_3, %c0_4] : memref<39x128xf32, #tpu.memory_space<vmem>>, vector<3x128xf32>
    tpu.vector_store %arg3[%c0_3, %c0_4], %0 {strides = array<i32>} : memref<39x128xf32, #tpu.memory_space<vmem>>, vector<3x128xf32>,
    %3 = vector.extract_strided_slice %0 {offsets = [0, 0], sizes = [1, 128], strides = [1, 1]} : vector<3x128xf32> to vector<1x128xf32>
    %4 = vector.broadcast %3 : vector<1x128xf32> to vector<6x128xf32>
    %5 = vector.broadcast %1 : vector<6x1xf32> to vector<6x128xf32>
    %6 = arith.mulf %4, %5 : vector<6x128xf32>
    %7 = math.sin %6 : vector<6x128xf32>
    %c3 = arith.constant 3 : index
    %c0_5 = arith.constant 0 : index
    %8 = vector.load %arg3[%c3, %c0_5] : memref<39x128xf32, #tpu.memory_space<vmem>>, vector<6x128xf32>
    tpu.vector_store %arg3[%c3, %c0_5], %7 {strides = array<i32>} : memref<39x128xf32, #tpu.memory_space<vmem>>, vector<6x128xf32>,
    %9 = math.cos %6 : vector<6x128xf32>
    %c21 = arith.constant 21 : index
    %c0_6 = arith.constant 0 : index
    %10 = vector.load %arg3[%c21, %c0_6] : memref<39x128xf32, #tpu.memory_space<vmem>>, vector<6x128xf32>
    tpu.vector_store %arg3[%c21, %c0_6], %9 {strides = array<i32>} : memref<39x128xf32, #tpu.memory_space<vmem>>, vector<6x128xf32>,
    %11 = vector.extract_strided_slice %0 {offsets = [1, 0], sizes = [1, 128], strides = [1, 1]} : vector<3x128xf32> to vector<1x128xf32>
    %12 = vector.broadcast %11 : vector<1x128xf32> to vector<6x128xf32>
    %13 = vector.broadcast %1 : vector<6x1xf32> to vector<6x128xf32>
    %14 = arith.mulf %12, %13 : vector<6x128xf32>
    %15 = math.sin %14 : vector<6x128xf32>
    %c9 = arith.constant 9 : index
    %c0_7 = arith.constant 0 : index
    %16 = vector.load %arg3[%c9, %c0_7] : memref<39x128xf32, #tpu.memory_space<vmem>>, vector<6x128xf32>
    tpu.vector_store %arg3[%c9, %c0_7], %15 {strides = array<i32>} : memref<39x128xf32, #tpu.memory_space<vmem>>, vector<6x128xf32>,
    %17 = math.cos %14 : vector<6x128xf32>
    %c27 = arith.constant 27 : index
    %c0_8 = arith.constant 0 : index
    %18 = vector.load %arg3[%c27, %c0_8] : memref<39x128xf32, #tpu.memory_space<vmem>>, vector<6x128xf32>
    tpu.vector_store %arg3[%c27, %c0_8], %17 {strides = array<i32>} : memref<39x128xf32, #tpu.memory_space<vmem>>, vector<6x128xf32>,
    %19 = vector.extract_strided_slice %0 {offsets = [2, 0], sizes = [1, 128], strides = [1, 1]} : vector<3x128xf32> to vector<1x128xf32>
    %20 = vector.broadcast %19 : vector<1x128xf32> to vector<6x128xf32>
    %21 = vector.broadcast %1 : vector<6x1xf32> to vector<6x128xf32>
    %22 = arith.mulf %20, %21 : vector<6x128xf32>
    %23 = math.sin %22 : vector<6x128xf32>
    %c15 = arith.constant 15 : index
    %c0_9 = arith.constant 0 : index
    %24 = vector.load %arg3[%c15, %c0_9] : memref<39x128xf32, #tpu.memory_space<vmem>>, vector<6x128xf32>
    tpu.vector_store %arg3[%c15, %c0_9], %23 {strides = array<i32>} : memref<39x128xf32, #tpu.memory_space<vmem>>, vector<6x128xf32>,
    %25 = math.cos %22 : vector<6x128xf32>
    %c33 = arith.constant 33 : index
    %c0_10 = arith.constant 0 : index
    %26 = vector.load %arg3[%c33, %c0_10] : memref<39x128xf32, #tpu.memory_space<vmem>>, vector<6x128xf32>
    tpu.vector_store %arg3[%c33, %c0_10], %25 {strides = array<i32>} : memref<39x128xf32, #tpu.memory_space<vmem>>, vector<6x128xf32>,
    return
  }
  func.func @transform_0(%arg0: i32) -> (i32, i32) {
    %c0_i32 = arith.constant 0 : i32
    %c0_i32_0 = arith.constant 0 : i32
    %c0_i32_1 = arith.constant 0 : i32
    return %c0_i32, %c0_i32_0 : i32, i32
  }
  func.func @transform_1(%arg0: i32) -> (i32, i32) {
    %c0_i32 = arith.constant 0 : i32
    %c0_i32_0 = arith.constant 0 : i32
    return %c0_i32, %arg0 : i32, i32
  }
  func.func @transform_2(%arg0: i32) -> (i32, i32) {
    %c0_i32 = arith.constant 0 : i32
    %c0_i32_0 = arith.constant 0 : i32
    return %c0_i32, %arg0 : i32, i32
  }
}

</mosaic_0001>

<bundles_post_ra>
// kernel: tpu_custom_call.1
= control target key start
LH: loop header
LB: loop body
LE: loop exit
PB: predicated region body
PF: predicated region fallthrough
CT: control target
= control target key end

     0   :  { %s968_s0 = inlined_call_operand.vmem [shape: f32[6,1], index: 0, kind: input, shape index: {}]   ;;  %s969_s1 = inlined_call_operand.vmem [shape: f32[3,128], index: 1, kind: input, shape index: {}]   ;;  %s970_s2 = inlined_call_operand.hbm [shape: f32[39,128], index: 2, kind: output, shape index: {}]  }
   0x1   :  { %v13_v0 = vld [vmem:[%s968_s0] sm:$0x3f] }
   0x2   :  { %7 = vsyncpa [#allocation3], 0  ;;  %v761_v1 = vmov 0   ;;  %v12_v2 = vld [vmem:[%s969_s1] sm:$0x7]  ;;  %v15_v3 = vlaneseq  ;;  %s768_s0 = smov [#allocation2]  }
   0x3   :  { %724 = vset.pattern.permute.xlu0 %v761_v1  ;;  %14 = vst [vmem:[#allocation2] sm:$0x7] %v12_v2  ;;  %v762_v41 = vmov 683565275   ;;  %v763_v45 = vmov 2475754826  }
   0x4   :  { %21 = vperm.xlu0 %724, %v13_v0   ;;  %v16_v4 = vshrl.u32 %v15_v3, 7  ;;  %v764_v47 = vmov 2131351028   ;;  %v765_v49 = vmov 2102212464   ;;  %s667_s1 = sshll.u32 %s768_s0, 4  ;;  %s668_s1 = int_to_ptr.vmem [resolvable:$true] %s667_s1 }
   0x5   :  { %v766_v51 = vmov 920167782   ;;  %v767_v58 = vmov 1326507024   ;;  %s737_s13 = scalar_lea.vmem %s668_s1, 640  ;;  %p742_p1 = scmp.lt.s32.totalorder %s668_s1, %s668_s1 }
   0x6   :  { %v17_v5 = vsub.s32 0, %v16_v4  ;;  %v236_v6 = vsub.s32 1, %v16_v4  ;;  %v450_v7 = vsub.s32 2, %v16_v4  ;;  %p738_p0 = scmp.ne.s32.totalorder %s668_s1, %s737_s13  ;;  %p743_p2 = scmp.lt.s32.totalorder %s737_s13, %s737_s13 }
   0x8   :  { %v18_v8 = vrot.slane %v12_v2, %v17_v5  ;;  %v237_v9 = vrot.slane %v12_v2, %v236_v6  ;;  %v451_v10 = vrot.slane %v12_v2, %v450_v7  ;;  %p744_p3 = por %p743_p2, %p742_p1 }
   0xa   :  { %p745_p4 = pnand %p744_p3, %p738_p0 }
  0x83   :  { %v22_v11 = vpop.permute.xlu0 %21 }
  0x84   :  { %v792_v12 = vmul.f32 %v22_v11, %v18_v8  ;;  %v794_v13 = vmul.f32 %v237_v9, %v22_v11  ;;  %v796_v14 = vmul.f32 %v451_v10, %v22_v11 }
  0x86   :  { %v25_v15 = vand.u32 2147483647, %v792_v12  ;;  %v28_v16 = vand.u32 2139095040, %v792_v12  ;;  %v239_v17 = vand.u32 2147483647, %v794_v13  ;;  %v242_v18 = vand.u32 2139095040, %v794_v13 }
  0x87   :  { %v456_v23 = vand.u32 2139095040, %v796_v14  ;;  %v453_v38 = vand.u32 2147483647, %v796_v14 }
  0x88   :  { %v29_v19 = vshrl.u32 %v28_v16, 23  ;;  %v32_v20 = vand.u32 8388607, %v25_v15  ;;  %v243_v21 = vshrl.u32 %v242_v18, 23  ;;  %v246_v22 = vand.u32 8388607, %v239_v17 }
  0x89   :  { %v457_v26 = vshrl.u32 %v456_v23, 23 }
  0x8a   :  { %v678_v24 = vadd.s32 4294967169, %v29_v19  ;;  %v686_v25 = vadd.s32 4294967169, %v243_v21  ;;  %v33_v28 = vor.u32 8388608, %v32_v20  ;;  %v247_v29 = vor.u32 8388608, %v246_v22 }
  0x8b   :  { %v694_v31 = vadd.s32 4294967169, %v457_v26 }
  0x8c   :  { %v35_v27 = vadd.s32 1, %v678_v24  ;;  %v249_v30 = vadd.s32 1, %v686_v25  ;;  %v807_v36 = vshll.u32 %v33_v28, 8  ;;  %v809_v37 = vshll.u32 %v247_v29, 8 }
  0x8d   :  { %v812_v39 = vadd.s32 1, %v694_v31 }
  0x8e   :  { %vm36_vm0 = vcmp.gt.s32.totalorder %v35_v27, 0  ;;  %vm250_vm1 = vcmp.gt.s32.totalorder %v249_v30, 0 }
  0x8f   :  { %v37_v32 = vsel %vm36_vm0, %v35_v27, 0  ;;  %v251_v35 = vsel %vm250_vm1, %v249_v30, 0  ;;  %vm464_vm6 = vcmp.gt.s32.totalorder %v812_v39, 0 }
  0x90   :  { %v38_v33 = vshrl.u32 %v37_v32, 5  ;;  %v39_v34 = vand.u32 31, %v37_v32  ;;  %v815_v43 = vshrl.u32 %v251_v35, 5  ;;  %v253_v44 = vand.u32 31, %v251_v35 }
  0x92   :  { %v40_v40 = vsub.s32 32, %v39_v34  ;;  %v42_v42 = vshll.u32 %v762_v41, %v39_v34  ;;  %v45_v46 = vshll.u32 %v763_v45, %v39_v34  ;;  %v48_v48 = vshll.u32 %v764_v47, %v39_v34 }
  0x93   :  { %v51_v50 = vshll.u32 %v765_v49, %v39_v34  ;;  %v54_v52 = vshll.u32 %v766_v51, %v39_v34  ;;  %vm57_vm2 = vcmp.lt.s32.totalorder %v38_v33, 1  ;;  %vm58_vm3 = vcmp.lt.s32.totalorder %v38_v33, 2 }
  0x94   :  { %v43_v53 = vshrl.u32 %v763_v45, %v40_v40  ;;  %v46_v54 = vshrl.u32 %v764_v47, %v40_v40  ;;  %v49_v55 = vshrl.u32 %v765_v49, %v40_v40  ;;  %v41_v56 = vshrl.u32 %v762_v41, %v40_v40 }
  0x95   :  { %v52_v57 = vshrl.u32 %v766_v51, %v40_v40  ;;  %v55_v59 = vshrl.u32 %v767_v58, %v40_v40  ;;  %v254_v63 = vsub.s32 32, %v253_v44  ;;  %vm59_vm4 = vcmp.lt.s32.totalorder %v38_v33, 3 }
  0x96   :  { %v44_v60 = vor.u32 %v43_v53, %v42_v42  ;;  %v47_v61 = vor.u32 %v46_v54, %v45_v46  ;;  %v50_v62 = vor.u32 %v49_v55, %v48_v48  ;;  %vm60_vm5 = vcmp.lt.s32.totalorder %v38_v33, 4 }
  0x97   :  { %v53_v0 = vor.u32 %v52_v57, %v51_v50  ;;  %v56_v1 = vor.u32 %v55_v59, %v54_v52  ;;  %v256_v9 = vshll.u32 %v762_v41, %v253_v44  ;;  %v257_v16 = vshrl.u32 %v763_v45, %v254_v63 }
  0x98   :  { %v61_v2 = vsel %vm57_vm2, %v41_v56, %v44_v60  ;;  %v62_v3 = vsel %vm60_vm5, %v50_v62, 2102212464  ;;  %v65_v4 = vsel %vm57_vm2, %v44_v60, %v47_v61  ;;  %v69_v5 = vsel %vm57_vm2, %v47_v61, %v50_v62 }
  0x99   :  { %v63_v6 = vsel %vm59_vm4, %v47_v61, %v62_v3  ;;  %v66_v7 = vsel %vm60_vm5, %v53_v0, 920167782  ;;  %v70_v8 = vsel %vm60_vm5, %v56_v1, 1326507024  ;;  %v259_v18 = vshll.u32 %v763_v45, %v253_v44 }
  0x9a   :  { %v67_v10 = vsel %vm59_vm4, %v50_v62, %v66_v7  ;;  %v71_v11 = vsel %vm59_vm4, %v53_v0, %v70_v8  ;;  %v64_v19 = vsel %vm58_vm3, %v61_v2, %v63_v6  ;;  %v260_v22 = vshrl.u32 %v764_v47, %v254_v63 }
  0x9b   :  { %v68_v20 = vsel %vm58_vm3, %v65_v4, %v67_v10  ;;  %v72_v21 = vsel %vm58_vm3, %v69_v5, %v71_v11  ;;  %v258_v27 = vor.u32 %v257_v16, %v256_v9  ;;  %v262_v29 = vshll.u32 %v764_v47, %v253_v44 }
  0x9c   :  { %v838_v23 = vmul.u32.u64.low %v807_v36, %v72_v21  ;;  %v839_v24 = vmul.u32.u64.high %v807_v36, %v72_v21, %v838_v23  ;;  %v842_v25 = vmul.u32.u64.low %v807_v36, %v68_v20  ;;  %v843_v26 = vmul.u32.u64.high %v807_v36, %v68_v20, %v842_v25 }
  0x9d   :  { %v261_v28 = vor.u32 %v260_v22, %v259_v18  ;;  %v263_v30 = vshrl.u32 %v765_v49, %v254_v63  ;;  %v265_v31 = vshll.u32 %v765_v49, %v253_v44  ;;  %v266_v32 = vshrl.u32 %v766_v51, %v254_v63 }
  0x9e   :  { %v269_v33 = vshrl.u32 %v767_v58, %v254_v63  ;;  %v80_v34 = vmul.u32 %v807_v36, %v64_v19  ;;  %v255_v35 = vshrl.u32 %v762_v41, %v254_v63  ;;  %v268_v42 = vshll.u32 %v766_v51, %v253_v44 }
  0x9f   :  { %v264_v40 = vor.u32 %v263_v30, %v262_v29  ;;  %vm82_vm7 = vc.u32 %v839_v24, %v842_v25  ;;  %v83_v46 = vadd.s32 1, %v843_v26  ;;  %v267_v48 = vor.u32 %v266_v32, %v265_v31 }
  0xa0   :  { %vm271_vm8 = vcmp.lt.s32.totalorder %v815_v43, 1  ;;  %v270_v50 = vor.u32 %v269_v33, %v268_v42  ;;  %vm273_vm9 = vcmp.lt.s32.totalorder %v815_v43, 3  ;;  %vm274_vm10 = vcmp.lt.s32.totalorder %v815_v43, 4 }
  0xa1   :  { %v279_v52 = vsel %vm271_vm8, %v258_v27, %v261_v28  ;;  %v84_v36 = vsel %vm82_vm7, %v83_v46, %v843_v26  ;;  %v276_v53 = vsel %vm274_vm10, %v264_v40, 2102212464  ;;  %v280_v54 = vsel %vm274_vm10, %v267_v48, 920167782 }
  0xa2   :  { %v283_v55 = vsel %vm271_vm8, %v261_v28, %v264_v40  ;;  %v85_v44 = vadd.s32 %v84_v36, %v80_v34  ;;  %vm272_vm11 = vcmp.lt.s32.totalorder %v815_v43, 2  ;;  %v281_v56 = vsel %vm273_vm9, %v264_v40, %v280_v54 }
  0xa3   :  { %v284_v57 = vsel %vm274_vm10, %v270_v50, 1326507024  ;;  %v275_v59 = vsel %vm271_vm8, %v255_v35, %v258_v27  ;;  %v277_v60 = vsel %vm273_vm9, %v261_v28, %v276_v53  ;;  %v282_v61 = vsel %vm272_vm11, %v279_v52, %v281_v56 }
  0xa4   :  { %v285_v62 = vsel %vm273_vm9, %v267_v48, %v284_v57  ;;  %v86_v63 = vadd.s32 536870912, %v85_v44  ;;  %v864_v1 = vmul.u32.u64.low %v809_v37, %v282_v61  ;;  %v865_v2 = vmul.u32.u64.high %v809_v37, %v282_v61, %v864_v1 }
  0xa5   :  { %v286_v0 = vsel %vm272_vm11, %v283_v55, %v285_v62  ;;  %v465_v43 = vsel %vm464_vm6, %v812_v39, 0  ;;  %v278_v6 = vsel %vm272_vm11, %v275_v59, %v277_v60  ;;  %v460_v9 = vand.u32 8388607, %v453_v38 }
  0xa6   :  { %v869_v3 = vmul.u32.u64.low %v809_v37, %v286_v0  ;;  %v870_v4 = vmul.u32.u64.high %v809_v37, %v286_v0, %v869_v3  ;;  %v875_v5 = vshrl.u32 %v86_v63, 30  ;;  %v297_v8 = vadd.s32 1, %v865_v2 }
  0xa7   :  { %v467_v10 = vand.u32 31, %v465_v43  ;;  %v294_v11 = vmul.u32 %v809_v37, %v278_v6  ;;  %v461_v20 = vor.u32 8388608, %v460_v9  ;;  %v466_v31 = vshrl.u32 %v465_v43, 5 }
  0xa8   :  { %v88_v7 = vshll.u32 %v875_v5, 30  ;;  %vm296_vm12 = vc.u32 %v870_v4, %v864_v1  ;;  %v81_v46 = vadd.s32 %v842_v25, %v839_v24  ;;  %vm27_vm4 = vcmp.lt.s32.totalorder %v792_v12, 0 }
  0xa9   :  { %v298_v18 = vsel %vm296_vm12, %v297_v8, %v865_v2  ;;  %v468_v21 = vsub.s32 32, %v467_v10  ;;  %v889_v37 = vshll.u32 %v461_v20, 8  ;;  %v470_v35 = vshll.u32 %v762_v41, %v467_v10 }
  0xaa   :  { %v89_v16 = vsub.s32 %v85_v44, %v88_v7  ;;  %v299_v39 = vadd.s32 %v298_v18, %v294_v11  ;;  %v473_v40 = vshll.u32 %v763_v45, %v467_v10  ;;  %v479_v42 = vshll.u32 %v765_v49, %v467_v10 }
  0xab   :  { %v471_v28 = vshrl.u32 %v763_v45, %v468_v21  ;;  %v474_v29 = vshrl.u32 %v764_v47, %v468_v21  ;;  %v477_v32 = vshrl.u32 %v765_v49, %v468_v21  ;;  %v480_v33 = vshrl.u32 %v766_v51, %v468_v21 }
  0xac   :  { %v91_v19 = vsub.s32 0, %v89_v16  ;;  %v300_v22 = vadd.s32 536870912, %v299_v39  ;;  %v476_v50 = vshll.u32 %v764_v47, %v467_v10  ;;  %v483_v52 = vshrl.u32 %v767_v58, %v468_v21 }
  0xad   :  { %v472_v36 = vor.u32 %v471_v28, %v470_v35  ;;  %v475_v53 = vor.u32 %v474_v29, %v473_v40  ;;  %v481_v54 = vor.u32 %v480_v33, %v479_v42  ;;  %v482_v57 = vshll.u32 %v766_v51, %v467_v10 }
  0xae   :  { %v679_v23 = vmin.u32 %v91_v19, %v89_v16  ;;  %v885_v26 = vshrl.u32 %v300_v22, 30  ;;  %v478_v56 = vor.u32 %v477_v32, %v476_v50  ;;  %vm485_vm14 = vcmp.lt.s32.totalorder %v466_v31, 1 }
  0xaf   :  { %vm486_vm15 = vcmp.lt.s32.totalorder %v466_v31, 2  ;;  %v484_v25 = vor.u32 %v483_v52, %v482_v57  ;;  %vm488_vm0 = vcmp.lt.s32.totalorder %v466_v31, 4  ;;  %v493_v58 = vsel %vm485_vm14, %v472_v36, %v475_v53 }
  0xb0   :  { %v93_v27 = vclz %v679_v23  ;;  %v302_v30 = vshll.u32 %v885_v26, 30  ;;  %v494_v61 = vsel %vm488_vm0, %v481_v54, 920167782  ;;  %v469_v63 = vshrl.u32 %v762_v41, %v468_v21 }
  0xb1   :  { %vm487_vm1 = vcmp.lt.s32.totalorder %v466_v31, 3  ;;  %v490_v51 = vsel %vm488_vm0, %v478_v56, 2102212464  ;;  %v497_v43 = vsel %vm485_vm14, %v475_v53, %v478_v56  ;;  %v498_v9 = vsel %vm488_vm0, %v484_v25, 1326507024 }
  0xb2   :  { %v680_v34 = vadd.s32 4294967294, %v93_v27  ;;  %v303_v48 = vsub.s32 %v299_v39, %v302_v30  ;;  %v495_v3 = vsel %vm487_vm1, %v478_v56, %v494_v61  ;;  %v489_v7 = vsel %vm485_vm14, %v469_v63, %v472_v36 }
  0xb3   :  { %v496_v8 = vsel %vm486_vm15, %v493_v58, %v495_v3  ;;  %v499_v18 = vsel %vm487_vm1, %v481_v54, %v498_v9  ;;  %v295_v27 = vadd.s32 %v864_v1, %v870_v4  ;;  %v111_v33 = vsub.s32 4, %v875_v5 }
  0xb4   :  { %vm681_vm13 = vcmp.lt.s32.totalorder %v680_v34, 0  ;;  %v305_v44 = vsub.s32 0, %v303_v48  ;;  %v500_v41 = vsel %vm486_vm15, %v497_v43, %v499_v18  ;;  %vm26_vm5 = vcmp.le.f32.partialorder %v25_v15, 0.7853982 }
  0xb5   :  { %v96_v55 = vsel %vm681_vm13, 0, %v680_v34  ;;  %v912_v39 = vmul.u32.u64.low %v889_v37, %v496_v8  ;;  %v913_v19 = vmul.u32.u64.high %v889_v37, %v496_v8, %v912_v39  ;;  %v112_v52 = vsel %vm27_vm4, %v111_v33, %v875_v5 }
  0xb6   :  { %v97_v45 = vsub.s32 32, %v96_v55  ;;  %v101_v59 = vsub.s32 4294967266, %v96_v55  ;;  %v98_v49 = vshll.u32 %v89_v16, %v96_v55  ;;  %v687_v24 = vmin.u32 %v305_v44, %v303_v48 }
  0xb7   :  { %v491_v16 = vsel %vm487_vm1, %v475_v53, %v490_v51  ;;  %v917_v22 = vmul.u32.u64.low %v889_v37, %v500_v41  ;;  %v918_v23 = vmul.u32.u64.high %v889_v37, %v500_v41, %v917_v22  ;;  %v511_v42 = vadd.s32 1, %v913_v19 }
  0xb8   :  { %v99_v47 = vshrl.u32 %v81_v46, %v97_v45  ;;  %v102_v60 = vadd.s32 127, %v101_v59  ;;  %v307_v62 = vclz %v687_v24  ;;  %v492_v30 = vsel %vm486_vm15, %v489_v7, %v491_v16 }
  0xb9   :  { %v508_v50 = vmul.u32 %v889_v37, %v492_v30  ;;  %vm510_vm3 = vc.u32 %v918_v23, %v912_v39  ;;  %v114_v55 = vsel %vm26_vm5, 0, %v112_v52  ;;  %v325_v59 = vsub.s32 4, %v885_v26 }
  0xba   :  { %v100_v0 = vor.u32 %v99_v47, %v98_v49  ;;  %v103_v2 = vshll.u32 %v102_v60, 23  ;;  %v688_v6 = vadd.s32 4294967294, %v307_v62  ;;  %v512_v31 = vsel %vm510_vm3, %v511_v42, %v913_v19 }
  0xbb   :  { %v513_v36 = vadd.s32 %v512_v31, %v508_v50  ;;  %v118_v49 = vadd.s32 3, %v114_v55  ;;  %vm241_vm6 = vcmp.lt.s32.totalorder %v794_v13, 0  ;;  %v223_v25 = vand.u32 3, %v114_v55 }
  0xbc   :  { %v104_v10 = vor.u32 4788187, %v103_v2  ;;  %v107_v11 = vcvt.s32.f32 %v100_v0  ;;  %vm689_vm2 = vcmp.lt.s32.totalorder %v688_v6, 0  ;;  %vm240_vm7 = vcmp.le.f32.partialorder %v239_v17, 0.7853982 }
  0xbd   :  { %v310_v21 = vsel %vm689_vm2, 0, %v688_v6  ;;  %v514_v37 = vadd.s32 536870912, %v513_v36  ;;  %v326_v60 = vsel %vm241_vm6, %v325_v59, %v885_v26  ;;  %v119_v58 = vand.u32 3, %v118_v49 }
  0xbe   :  { %v105_v20 = vand.u32 2147483647, %v104_v10  ;;  %v311_v28 = vsub.s32 32, %v310_v21  ;;  %v315_v29 = vsub.s32 4294967266, %v310_v21  ;;  %v312_v34 = vshll.u32 %v303_v48, %v310_v21 }
  0xbf   :  { %v934_v57 = vshrl.u32 %v514_v37, 30  ;;  %v328_v51 = vsel %vm240_vm7, 0, %v326_v60  ;;  %vm224_vm8 = vcmp.lt.s32.totalorder %v223_v25, 2  ;;  %vm225_vm9 = vcmp.eq.s32.totalorder %v223_v25, 0 }
  0xc0   :  { %v108_v32 = vmul.f32 %v107_v11, %v105_v20  ;;  %v313_v35 = vshrl.u32 %v295_v27, %v311_v28  ;;  %v316_v40 = vadd.s32 127, %v315_v29  ;;  %vm124_vm10 = vcmp.eq.s32.totalorder %v119_v58, 2 }
  0xc1   :  { %v516_v15 = vshll.u32 %v934_v57, 30  ;;  %vm228_vm11 = vcmp.eq.s32.totalorder %v223_v25, 2  ;;  %vm121_vm12 = vcmp.eq.s32.totalorder %v119_v58, 0  ;;  %v332_v7 = vadd.s32 3, %v328_v51 }
  0xc2   :  { %v109_v46 = vxor.u32 2147483648, %v108_v32  ;;  %v314_v1 = vor.u32 %v313_v35, %v312_v34  ;;  %v317_v4 = vshll.u32 %v316_v40, 23  ;;  %vm120_vm13 = vcmp.lt.s32.totalorder %v119_v58, 2 }
  0xc3   :  { %v517_v5 = vsub.s32 %v513_v36, %v516_v15  ;;  %vm117_vm14 = vweird.f32 %v792_v12  ;;  %v437_v18 = vand.u32 3, %v328_v51  ;;  %v333_v20 = vand.u32 3, %v332_v7 }
  0xc4   :  { %v110_v48 = vsel %vm27_vm4, %v109_v46, %v108_v32  ;;  %v318_v54 = vor.u32 4788187, %v317_v4  ;;  %v321_v56 = vcvt.s32.f32 %v314_v1  ;;  %v509_v22 = vadd.s32 %v912_v39, %v918_v23 }
  0xc5   :  { %v113_v53 = vsel %vm26_vm5, %v792_v12, %v110_v48  ;;  %v519_v62 = vsub.s32 0, %v517_v5  ;;  %vm439_vm0 = vcmp.eq.s32.totalorder %v437_v18, 0  ;;  %vm335_vm1 = vcmp.eq.s32.totalorder %v333_v20, 0 }
  0xc6   :  { %725 = vcosq.f32 %v113_v53  ;;  %v319_v44 = vand.u32 2147483647, %v318_v54  ;;  %vm338_vm2 = vcmp.eq.s32.totalorder %v333_v20, 2  ;;  %vm442_vm3 = vcmp.eq.s32.totalorder %v437_v18, 2 }
  0xc7   :  { %727 = vsinq.f32 %v113_v53  ;;  %v695_v0 = vmin.u32 %v519_v62, %v517_v5  ;;  %vm334_vm4 = vcmp.lt.s32.totalorder %v333_v20, 2  ;;  %vm438_vm5 = vcmp.lt.s32.totalorder %v437_v18, 2 }
  0xc8   :  { %v322_v45 = vmul.f32 %v321_v56, %v319_v44  ;;  %v539_v37 = vsub.s32 4, %v934_v57 }
  0xc9   :  { %v521_v17 = vclz %v695_v0 }
  0xca   :  { %v323_v24 = vxor.u32 2147483648, %v322_v45 }
  0xcb   :  { %v696_v10 = vadd.s32 4294967294, %v521_v17 }
  0xcc   :  { %v324_v47 = vsel %vm241_vm6, %v323_v24, %v322_v45  ;;  %vm331_vm6 = vweird.f32 %v794_v13 }
  0xcd   :  { %v327_v61 = vsel %vm240_vm7, %v794_v13, %v324_v47  ;;  %vm697_vm15 = vcmp.lt.s32.totalorder %v696_v10, 0  ;;  %vm455_vm7 = vcmp.lt.s32.totalorder %v796_v14, 0 }
  0xce   :  { %729 = vcosq.f32 %v327_v61  ;;  %v524_v21 = vsel %vm697_vm15, 0, %v696_v10  ;;  %v540_v13 = vsel %vm455_vm7, %v539_v37, %v934_v57  ;;  %vm545_vm15 = vweird.f32 %v796_v14 }
  0xcf   :  { %731 = vsinq.f32 %v327_v61  ;;  %v525_v27 = vsub.s32 32, %v524_v21  ;;  %v529_v28 = vsub.s32 4294967266, %v524_v21  ;;  %v526_v32 = vshll.u32 %v517_v5, %v524_v21 }
  0xd0   :  { %v726_v63 = vpop.eup %725 }
  0xd1   :  { %v728_v2 = vpop.eup %727  ;;  %v125_v3 = vxor.u32 2147483648, %v726_v63  ;;  %v527_v33 = vshrl.u32 %v509_v22, %v525_v27  ;;  %v530_v34 = vadd.s32 127, %v529_v28 }
  0xd2   :  { %v122_v43 = vxor.u32 2147483648, %v728_v2 }
  0xd3   :  { %v126_v6 = vsel %vm124_vm10, %v125_v3, %v728_v2  ;;  %v230_v26 = vsel %vm228_vm11, %v125_v3, %v728_v2  ;;  %v528_v46 = vor.u32 %v527_v33, %v526_v32  ;;  %v531_v50 = vshll.u32 %v530_v34, 23 }
  0xd4   :  { %v123_v8 = vsel %vm121_vm12, %v726_v63, %v122_v43  ;;  %v227_v9 = vsel %vm225_vm9, %v726_v63, %v122_v43 }
  0xd5   :  { %v127_v11 = vsel %vm120_vm13, %v123_v8, %v126_v6  ;;  %v231_v16 = vsel %vm224_vm8, %v227_v9, %v230_v26  ;;  %v532_v31 = vor.u32 4788187, %v531_v50  ;;  %v535_v53 = vcvt.s32.f32 %v528_v46 }
  0xd6   :  { %v128_v41 = vsel %vm117_vm14, nan, %v127_v11  ;;  %v232_v19 = vsel %vm117_vm14, nan, %v231_v16  ;;  %vm454_vm8 = vcmp.le.f32.partialorder %v453_v38, 0.7853982 }
  0xd7   :  { %129 = vst [vmem:[#allocation2 + $0x3] sm:$0x3f] %v128_v41  ;;  %233 = vst [vmem:[#allocation2 + $0x15] sm:$0x3f] %v232_v19  ;;  %v533_v36 = vand.u32 2147483647, %v532_v31 }
  0xd8   :  { %v730_v29 = vpop.eup %729  ;;  %v542_v45 = vsel %vm454_vm8, 0, %v540_v13 }
  0xd9   :  { %v732_v30 = vpop.eup %731  ;;  %v339_v12 = vxor.u32 2147483648, %v730_v29  ;;  %v536_v54 = vmul.f32 %v535_v53, %v533_v36  ;;  %v546_v59 = vadd.s32 3, %v542_v45  ;;  %v651_v15 = vand.u32 3, %v542_v45 }
  0xda   :  { %v336_v35 = vxor.u32 2147483648, %v732_v30 }
  0xdb   :  { %v340_v40 = vsel %vm338_vm2, %v339_v12, %v732_v30  ;;  %v444_v42 = vsel %vm442_vm3, %v339_v12, %v732_v30  ;;  %v537_v55 = vxor.u32 2147483648, %v536_v54  ;;  %v547_v49 = vand.u32 3, %v546_v59 }
  0xdc   :  { %v337_v1 = vsel %vm335_vm1, %v730_v29, %v336_v35  ;;  %v441_v39 = vsel %vm439_vm0, %v730_v29, %v336_v35  ;;  %vm656_vm10 = vcmp.eq.s32.totalorder %v651_v15, 2  ;;  %vm653_vm12 = vcmp.eq.s32.totalorder %v651_v15, 0 }
  0xdd   :  { %v341_v23 = vsel %vm334_vm4, %v337_v1, %v340_v40  ;;  %v445_v4 = vsel %vm438_vm5, %v441_v39, %v444_v42  ;;  %v538_v44 = vsel %vm455_vm7, %v537_v55, %v536_v54  ;;  %vm552_vm9 = vcmp.eq.s32.totalorder %v547_v49, 2 }
  0xde   :  { %v342_v48 = vsel %vm331_vm6, nan, %v341_v23  ;;  %v446_v52 = vsel %vm331_vm6, nan, %v445_v4  ;;  %v541_v56 = vsel %vm454_vm8, %v796_v14, %v538_v44  ;;  %vm549_vm11 = vcmp.eq.s32.totalorder %v547_v49, 0 }
  0xdf   :  { %343 = vst [vmem:[#allocation2 + $0x9] sm:$0x3f] %v342_v48  ;;  %447 = vst [vmem:[#allocation2 + $0x1b] sm:$0x3f] %v446_v52  ;;  %733 = vcosq.f32 %v541_v56  ;;  %vm548_vm13 = vcmp.lt.s32.totalorder %v547_v49, 2  ;;  %vm652_vm14 = vcmp.lt.s32.totalorder %v651_v15, 2 }
  0xe0   :  { %735 = vsinq.f32 %v541_v56 }
  0xe9   :  { %v734_v24 = vpop.eup %733 }
  0xea   :  { %v736_v5 = vpop.eup %735  ;;  %v553_v25 = vxor.u32 2147483648, %v734_v24 }
  0xeb   :  { %v550_v47 = vxor.u32 2147483648, %v736_v5 }
  0xec   :  { %v554_v38 = vsel %vm552_vm9, %v553_v25, %v736_v5  ;;  %v658_v57 = vsel %vm656_vm10, %v553_v25, %v736_v5 }
  0xed   :  { %v551_v60 = vsel %vm549_vm11, %v734_v24, %v550_v47  ;;  %v655_v58 = vsel %vm653_vm12, %v734_v24, %v550_v47 }
  0xee   :  { %v555_v61 = vsel %vm548_vm13, %v551_v60, %v554_v38  ;;  %v659_v62 = vsel %vm652_vm14, %v655_v58, %v658_v57 }
  0xef   :  { %v556_v63 = vsel %vm545_vm15, nan, %v555_v61  ;;  %v660_v51 = vsel %vm545_vm15, nan, %v659_v62 }
  0xf0   :  { %557 = vst [vmem:[#allocation2 + $0xf] sm:$0x3f] %v556_v63  ;;  %661 = vst [vmem:[#allocation2 + $0x21] sm:$0x3f] %v660_v51 }
  0xf1   :  { %748 = shalt.err (!%p745_p4)
}
  0xf2   :  { %s749_s16 = scalar_lea.hbm %s970_s2, 640 }
  0xf3   :  { %p750_p5 = scmp.ne.s32.totalorder %s970_s2, %s749_s16  ;;  %p753_p6 = scmp.lt.u32.totalorder %s749_s16, %s970_s2 }
  0xf5   :  { %p755_p7 = pnand %p753_p6, %p750_p5 }
  0xf7   :  { %758 = shalt.err (!%p755_p7)
}
  0xf8   :  { %s769_s21 = smov 128   ;;  %s770_s22 = smov 8  }
  0xf9   :  { %673 = dma.vmem_to_hbm [thread:$0]  %s668_s1, 640, %s970_s2, [#allocation3], %s769_s21, %s769_s21, %s770_s22  }
  0xfa   :  { %759 = dma.done.wait [#allocation3], 640  }
  0xfb   :  { %760 = vsyncadd [#allocation3], 4294966656 }
  0xfc   :  { %677 = vsyncpa [#allocation3], 1 }

</bundles_post_ra>
